<compile_context>
chip_gen: v7x
topology: tpu7x:2x2x1
jax: 0.10.0
libtpu: 0.0.40
codegen_flags: <defaults>
</compile_context>

<pallas_src>
import math
from functools import partial

import jax
import jax.numpy as jnp
from jax import lax
from jax.experimental import pallas as pl
from jax.experimental.pallas import tpu as pltpu


# ----------------------------------------------------------------------------
# Fused QKV projection: y = x @ W_qkv + b, split into q / k / v outputs.
# ----------------------------------------------------------------------------
def _qkv_proj_kernel(x_ref, w_ref, b_ref, q_ref, k_ref, v_ref, *, H):
    # x_ref: (tm, Hin); w_ref: (Hin, 3H) pre-transposed; b_ref: (1, 3H)
    y = jnp.dot(x_ref[...], w_ref[...], preferred_element_type=jnp.float32)
    y = (y + b_ref[...].astype(jnp.float32)).astype(q_ref.dtype)
    q_ref[...] = y[:, 0 * H:1 * H]
    k_ref[...] = y[:, 1 * H:2 * H]
    v_ref[...] = y[:, 2 * H:3 * H]


def _pick_tile(n, candidates=(512, 256, 128)):
    for t in candidates:
        if n % t == 0:
            return t
    return n  # fall back to the full extent (always a legal block)


def qkv_proj(x, w_qkv_t, b_qkv, out_dim):
    """x: [B,S,Hin]; w_qkv_t: [Hin, 3*out_dim]; b_qkv: [3*out_dim]
       -> (q, k, v) each [B, S, out_dim]."""
    B, S, Hin = x.shape
    N3 = w_qkv_t.shape[1]
    M = B * S
    tm = _pick_tile(M)
    xf = x.reshape(M, Hin)
    kernel = partial(_qkv_proj_kernel, H=out_dim)
    q, k, v = pl.pallas_call(
        kernel,
        out_shape=(
            jax.ShapeDtypeStruct((M, out_dim), x.dtype),
            jax.ShapeDtypeStruct((M, out_dim), x.dtype),
            jax.ShapeDtypeStruct((M, out_dim), x.dtype),
        ),
        grid=(M // tm,),
        in_specs=[
            pl.BlockSpec((tm, Hin), lambda i: (i, 0)),
            pl.BlockSpec((Hin, N3), lambda i: (0, 0)),
            pl.BlockSpec((1, N3), lambda i: (0, 0)),
        ],
        out_specs=(
            pl.BlockSpec((tm, out_dim), lambda i: (i, 0)),
            pl.BlockSpec((tm, out_dim), lambda i: (i, 0)),
            pl.BlockSpec((tm, out_dim), lambda i: (i, 0)),
        ),
        compiler_params=pltpu.CompilerParams(dimension_semantics=("parallel",)),
    )(xf, w_qkv_t, b_qkv.reshape(1, N3))
    return (q.reshape(B, S, out_dim),
            k.reshape(B, S, out_dim),
            v.reshape(B, S, out_dim))


# ----------------------------------------------------------------------------
# Attention: lane-dense [S, H] I/O, per-head math inside, flash KV tiling.
# ----------------------------------------------------------------------------
def _attn_kernel(q_ref, k_ref, v_ref, mask_ref, o_ref, m_sc, l_sc, acc_sc,
                 *, nH, dH, scale):
    kv = pl.program_id(1)

    @pl.when(kv == 0)
    def _():
        m_sc[...] = jnp.full_like(m_sc, -jnp.inf)
        l_sc[...] = jnp.zeros_like(l_sc)
        acc_sc[...] = jnp.zeros_like(acc_sc)

    q2 = q_ref[0]                              # [S, H]   lane-dense load
    k2 = k_ref[0]                              # [Tk, H]
    v2 = v_ref[0]                              # [Tk, H]
    mask = mask_ref[0].astype(jnp.float32)     # [1, Tk]  broadcast in-kernel

    # TODO(synk): nn.Dropout on attention probs is identity in eval mode; omitted.
    for h in range(nH):                        # static unroll over heads
        sl = slice(h * dH, (h + 1) * dH)
        qh, kh, vh = q2[:, sl], k2[:, sl], v2[:, sl]
        # scores: contract head_dim directly (no explicit K transpose)
        s = lax.dot_general(qh, kh, (((1,), (1,)), ((), ())),
                            preferred_element_type=jnp.float32) * scale
        s = s + mask                           # [S, Tk] + [1, Tk]
        m_prev = m_sc[h]                       # [S, 1]
        m_new = jnp.maximum(m_prev, jnp.max(s, axis=-1, keepdims=True))
        alpha = jnp.exp(m_prev - m_new)
        p = jnp.exp(s - m_new)
        l_sc[h] = alpha * l_sc[h] + jnp.sum(p, axis=-1, keepdims=True)
        acc_sc[h] = alpha * acc_sc[h] + jnp.dot(
            p.astype(vh.dtype), vh, preferred_element_type=jnp.float32)
        m_sc[h] = m_new

    @pl.when(kv == pl.num_programs(1) - 1)
    def _():
        outs = []
        for h in range(nH):
            l = l_sc[h]
            inv_l = pl.reciprocal(l, approx=True)
            inv_l = inv_l * (2.0 - l * inv_l)   # one Newton step -> ~f32 exact
            outs.append(acc_sc[h] * inv_l)      # [S, dH]
        # single lane-dense [S, H] store
        o_ref[0] = jnp.concatenate(outs, axis=-1).astype(o_ref.dtype)


def attention(q, k, v, mask_b1s, num_heads, head_dim):
    """q,k,v: [B, S, H] (heads interleaved on the last axis);
       mask_b1s: [B, 1, S] additive; -> [B, S, H]."""
    B, S, H = q.shape
    tkv = _pick_tile(S)
    n_kv = S // tkv
    kernel = partial(_attn_kernel, nH=num_heads, dH=head_dim,
                     scale=1.0 / math.sqrt(head_dim))
    return pl.pallas_call(
        kernel,
        out_shape=jax.ShapeDtypeStruct((B, S, H), q.dtype),
        grid=(B, n_kv),
        in_specs=[
            pl.BlockSpec((1, S, H), lambda b, kv: (b, 0, 0)),
            pl.BlockSpec((1, tkv, H), lambda b, kv: (b, kv, 0)),
            pl.BlockSpec((1, tkv, H), lambda b, kv: (b, kv, 0)),
            pl.BlockSpec((1, 1, tkv), lambda b, kv: (b, 0, kv)),
        ],
        out_specs=pl.BlockSpec((1, S, H), lambda b, kv: (b, 0, 0)),
        scratch_shapes=[
            pltpu.VMEM((num_heads, S, 1), jnp.float32),        # m
            pltpu.VMEM((num_heads, S, 1), jnp.float32),        # l
            pltpu.VMEM((num_heads, S, head_dim), jnp.float32),  # acc
        ],
        compiler_params=pltpu.CompilerParams(
            dimension_semantics=("parallel", "arbitrary")),
    )(q, k, v, mask_b1s)


# ----------------------------------------------------------------------------
# Module wrapper
# ----------------------------------------------------------------------------
class SelfAttention:
    def __init__(self, hidden_size, num_attention_heads,
                 attention_probs_dropout_prob, key):
        self.num_attention_heads = num_attention_heads
        self.attention_head_size = int(hidden_size / num_attention_heads)
        self.all_head_size = self.num_attention_heads * self.attention_head_size
        self.dropout_prob = attention_probs_dropout_prob  # identity in eval

        ks = jax.random.split(key, 12)
        bound = 1.0 / math.sqrt(hidden_size)

        def init_linear(kw, kb):
            w = jax.random.uniform(kw, (self.all_head_size, hidden_size),
                                   jnp.float32, -bound, bound)
            b = jax.random.uniform(kb, (self.all_head_size,),
                                   jnp.float32, -bound, bound)
            return w, b

        # Per-layer params (PyTorch [Hout, Hin] layout) kept for the reference.
        self.query = init_linear(ks[0], ks[1])
        self.key = init_linear(ks[2], ks[3])
        self.value = init_linear(ks[4], ks[5])
        self.query2 = init_linear(ks[6], ks[7])
        self.key2 = init_linear(ks[8], ks[9])
        self.value2 = init_linear(ks[10], ks[11])

        # Fused + pre-transposed weights: [Hin, 3*all_head_size] (done once).
        def fuse(lq, lk, lv):
            w = jnp.concatenate([lq[0], lk[0], lv[0]], axis=0).T
            b = jnp.concatenate([lq[1], lk[1], lv[1]], axis=0)
            return w, b

        self.w_qkv, self.b_qkv = fuse(self.query, self.key, self.value)
        self.w_qkv2, self.b_qkv2 = fuse(self.query2, self.key2, self.value2)

    def __call__(self, hidden_states, attention_mask, fusion):
        nH, dH, H = self.num_attention_heads, self.attention_head_size, self.all_head_size
        if fusion:
            x0, x1 = hidden_states
            B, S, _ = x0.shape
            mask = attention_mask.reshape(B, 1, S).astype(jnp.float32)
            q0, k0, v0 = qkv_proj(x0, self.w_qkv, self.b_qkv, H)
            q1, k1, v1 = qkv_proj(x1, self.w_qkv2, self.b_qkv2, H)
            # context_layer  = softmax(q1·k0ᵀ + mask)·v0
            # context_layer1 = softmax(q0·k1ᵀ + mask)·v1
            context_layer = attention(q1, k0, v0, mask, nH, dH)
            context_layer1 = attention(q0, k1, v1, mask, nH, dH)
            return jnp.stack([context_layer, context_layer1], axis=0)
        else:
            x = hidden_states
            B, S, _ = x.shape
            mask = attention_mask.reshape(B, 1, S).astype(jnp.float32)
            q, k, v = qkv_proj(x, self.w_qkv, self.b_qkv, H)
            return attention(q, k, v, mask, nH, dH)


# ----------------------------------------------------------------------------
# Pure-JAX reference for verification
# ----------------------------------------------------------------------------
def _ref_split_heads(x, nH, dH):
    B, S, _ = x.shape
    return jnp.transpose(x.reshape(B, S, nH, dH), (0, 2, 1, 3))


def _ref_merge_heads(x):
    B, nH, S, dH = x.shape
    return jnp.transpose(x, (0, 2, 1, 3)).reshape(B, S, nH * dH)


def _ref_attn(q, k, v, mask, dH):
    s = jnp.einsum('bhqd,bhkd->bhqk', q, k) / math.sqrt(dH)
    s = s + mask  # [B,1,1,S] broadcasts over heads / query positions
    p = jax.nn.softmax(s, axis=-1)
    return jnp.einsum('bhqk,bhkd->bhqd', p, v)


def _ref_forward_fused(mod, x0, x1, mask):
    nH, dH = mod.num_attention_heads, mod.attention_head_size
    lin = lambda x, wb: x @ wb[0].T + wb[1]
    sp = lambda t: _ref_split_heads(t, nH, dH)
    q0, k0, v0 = sp(lin(x0, mod.query)), sp(lin(x0, mod.key)), sp(lin(x0, mod.value))
    q1, k1, v1 = sp(lin(x1, mod.query2)), sp(lin(x1, mod.key2)), sp(lin(x1, mod.value2))
    ctx = _ref_merge_heads(_ref_attn(q1, k0, v0, mask, dH))
    ctx1 = _ref_merge_heads(_ref_attn(q0, k1, v1, mask, dH))
    return jnp.stack([ctx, ctx1], axis=0)


def _ref_forward_single(mod, x, mask):
    nH, dH = mod.num_attention_heads, mod.attention_head_size
    lin = lambda t, wb: t @ wb[0].T + wb[1]
    sp = lambda t: _ref_split_heads(t, nH, dH)
    q, k, v = sp(lin(x, mod.query)), sp(lin(x, mod.key)), sp(lin(x, mod.value))
    return _ref_merge_heads(_ref_attn(q, k, v, mask, dH))


# ----------------------------------------------------------------------------
if __name__ == "__main__":
    B, S, H, nH = 2, 8, 32, 4
    key = jax.random.PRNGKey(0)
    k_mod, k_x0, k_x1, k_m = jax.random.split(key, 4)

    mod = SelfAttention(hidden_size=H, num_attention_heads=nH,
                        attention_probs_dropout_prob=0.1, key=k_mod)

    x0 = jax.random.normal(k_x0, (B, S, H), jnp.float32)
    x1 = jax.random.normal(k_x1, (B, S, H), jnp.float32)
    # BERT-style additive mask: 0 for valid, -10000 for masked positions.
    valid = (jax.random.uniform(k_m, (B, 1, 1, S)) > 0.2).astype(jnp.float32)
    attention_mask = (1.0 - valid) * -10000.0

    # fusion=True path
    out_fused = jax.block_until_ready(mod((x0, x1), attention_mask, fusion=True))
    assert out_fused.shape == (2, B, S, H)

    # fusion=False path
    out_single = jax.block_until_ready(mod(x0, attention_mask, fusion=False))
    assert out_single.shape == (B, S, H)

    # verify against pure-JAX references
    ref_fused = _ref_forward_fused(mod, x0, x1, attention_mask)
    ref_single = _ref_forward_single(mod, x0, attention_mask)
    assert jnp.allclose(out_fused, ref_fused, atol=1e-4, rtol=1e-3), \
        float(jnp.max(jnp.abs(out_fused - ref_fused)))
    assert jnp.allclose(out_single, ref_single, atol=1e-4, rtol=1e-3), \
        float(jnp.max(jnp.abs(out_single - ref_single)))

    print("KERNEL_OK")
</pallas_src>

<mosaic_0001>
module attributes {stable_mosaic.version = 11 : i64} {
  func.func @_qkv_proj_kernel(%arg0: i32, %arg1: memref<16x32xf32, #tpu.memory_space<vmem>>, %arg2: memref<32x96xf32, #tpu.memory_space<vmem>>, %arg3: memref<1x96xf32, #tpu.memory_space<vmem>>, %arg4: memref<16x32xf32, #tpu.memory_space<vmem>>, %arg5: memref<16x32xf32, #tpu.memory_space<vmem>>, %arg6: memref<16x32xf32, #tpu.memory_space<vmem>>) attributes {dimension_semantics = [#tpu.dimension_semantics<parallel>], iteration_bounds = array<i64: 1>, scalar_prefetch = 0 : i64, scratch_operands = 0 : i64, tpu.core_type = #tpu.core_type<tc>, window_params = [{transform_indices = @transform_0, window_bounds = array<i64: 16, 32>}, {pipeline_mode = #tpu.pipeline_mode<synchronous>, transform_indices = @transform_1, window_bounds = array<i64: 32, 96>}, {pipeline_mode = #tpu.pipeline_mode<synchronous>, transform_indices = @transform_2, window_bounds = array<i64: 1, 96>}, {transform_indices = @transform_3, window_bounds = array<i64: 16, 32>}, {transform_indices = @transform_4, window_bounds = array<i64: 16, 32>}, {transform_indices = @transform_5, window_bounds = array<i64: 16, 32>}]} {
    %c0 = arith.constant 0 : index
    %c0_0 = arith.constant 0 : index
    %0 = vector.load %arg1[%c0, %c0_0] : memref<16x32xf32, #tpu.memory_space<vmem>>, vector<16x32xf32>
    %c0_1 = arith.constant 0 : index
    %c0_2 = arith.constant 0 : index
    %1 = vector.load %arg2[%c0_1, %c0_2] : memref<32x96xf32, #tpu.memory_space<vmem>>, vector<32x96xf32>
    %cst = arith.constant dense<0.000000e+00> : vector<16x96xf32>
    %2 = tpu.matmul %0, %1, %cst {dimension_numbers = #tpu.dot_dimension_numbers<[1], [0], [0], [1], [0, 0, 1, 1], [], []>} : vector<16x32xf32>, vector<32x96xf32>, vector<16x96xf32> -> vector<16x96xf32>
    %c0_3 = arith.constant 0 : index
    %c0_4 = arith.constant 0 : index
    %3 = vector.load %arg3[%c0_3, %c0_4] : memref<1x96xf32, #tpu.memory_space<vmem>>, vector<1x96xf32>
    %4 = vector.broadcast %3 : vector<1x96xf32> to vector<16x96xf32>
    %5 = arith.addf %2, %4 : vector<16x96xf32>
    %6 = vector.extract_strided_slice %5 {offsets = [0, 0], sizes = [16, 32], strides = [1, 1]} : vector<16x96xf32> to vector<16x32xf32>
    %c0_5 = arith.constant 0 : index
    %c0_6 = arith.constant 0 : index
    %7 = vector.load %arg4[%c0_5, %c0_6] : memref<16x32xf32, #tpu.memory_space<vmem>>, vector<16x32xf32>
    tpu.vector_store %arg4[%c0_5, %c0_6], %6 {strides = array<i32>} : memref<16x32xf32, #tpu.memory_space<vmem>>, vector<16x32xf32>,
    %8 = vector.extract_strided_slice %5 {offsets = [0, 32], sizes = [16, 32], strides = [1, 1]} : vector<16x96xf32> to vector<16x32xf32>
    %c0_7 = arith.constant 0 : index
    %c0_8 = arith.constant 0 : index
    %9 = vector.load %arg5[%c0_7, %c0_8] : memref<16x32xf32, #tpu.memory_space<vmem>>, vector<16x32xf32>
    tpu.vector_store %arg5[%c0_7, %c0_8], %8 {strides = array<i32>} : memref<16x32xf32, #tpu.memory_space<vmem>>, vector<16x32xf32>,
    %10 = vector.extract_strided_slice %5 {offsets = [0, 64], sizes = [16, 32], strides = [1, 1]} : vector<16x96xf32> to vector<16x32xf32>
    %c0_9 = arith.constant 0 : index
    %c0_10 = arith.constant 0 : index
    %11 = vector.load %arg6[%c0_9, %c0_10] : memref<16x32xf32, #tpu.memory_space<vmem>>, vector<16x32xf32>
    tpu.vector_store %arg6[%c0_9, %c0_10], %10 {strides = array<i32>} : memref<16x32xf32, #tpu.memory_space<vmem>>, vector<16x32xf32>,
    return
  }
  func.func @transform_0(%arg0: i32) -> (i32, i32) {
    %c0_i32 = arith.constant 0 : i32
    %c0_i32_0 = arith.constant 0 : i32
    return %arg0, %c0_i32 : i32, i32
  }
  func.func @transform_1(%arg0: i32) -> (i32, i32) {
    %c0_i32 = arith.constant 0 : i32
    %c0_i32_0 = arith.constant 0 : i32
    %c0_i32_1 = arith.constant 0 : i32
    return %c0_i32, %c0_i32_0 : i32, i32
  }
  func.func @transform_2(%arg0: i32) -> (i32, i32) {
    %c0_i32 = arith.constant 0 : i32
    %c0_i32_0 = arith.constant 0 : i32
    %c0_i32_1 = arith.constant 0 : i32
    return %c0_i32, %c0_i32_0 : i32, i32
  }
  func.func @transform_3(%arg0: i32) -> (i32, i32) {
    %c0_i32 = arith.constant 0 : i32
    %c0_i32_0 = arith.constant 0 : i32
    return %arg0, %c0_i32 : i32, i32
  }
  func.func @transform_4(%arg0: i32) -> (i32, i32) {
    %c0_i32 = arith.constant 0 : i32
    %c0_i32_0 = arith.constant 0 : i32
    return %arg0, %c0_i32 : i32, i32
  }
  func.func @transform_5(%arg0: i32) -> (i32, i32) {
    %c0_i32 = arith.constant 0 : i32
    %c0_i32_0 = arith.constant 0 : i32
    return %arg0, %c0_i32 : i32, i32
  }
}

</mosaic_0001>

<bundles_post_ra>
// kernel: tpu_custom_call.1
= control target key start
LH: loop header
LB: loop body
LE: loop exit
PB: predicated region body
PF: predicated region fallthrough
CT: control target
= control target key end

     0   :  { %11 = vsyncpa [#allocation3], 0  ;;  %s498_s0 = inlined_call_operand.hbm [shape: f32[16,32], index: 0, kind: input, shape index: {}]   ;;  %s499_s1 = inlined_call_operand.hbm [shape: f32[32,96], index: 1, kind: input, shape index: {}]   ;;  %s500_s2 = inlined_call_operand.vmem [shape: f32[1,96], index: 2, kind: input, shape index: {}]   ;;  %s501_s3 = inlined_call_operand.hbm [shape: f32[16,32], index: 3, kind: output, shape index: {0}]   ;;  %s502_s4 = inlined_call_operand.hbm [shape: f32[16,32], index: 4, kind: output, shape index: {1}]   ;;  %s503_s5 = inlined_call_operand.hbm [shape: f32[16,32], index: 5, kind: output, shape index: {2}]  }
   0x1   :  { %12 = vsyncpa [#allocation6], 0 }
   0x2   :  { %13 = vsyncpa [#allocation4], 0 }
   0x3   :  { %14 = vsyncpa [#allocation9], 0  ;;  %s366_s18 = smov [#allocation2]   ;;  %s248_s22 = scalar_lea.hbm %s498_s0, 256 }
   0x4   :  { %s20_s19 = sshll.u32 %s366_s18, 4  ;;  %p249_p0 = scmp.ne.s32.totalorder %s498_s0, %s248_s22  ;;  %s21_s19 = int_to_ptr.vmem [resolvable:$true] %s20_s19 }
   0x5   :  { %p252_p1 = scmp.lt.u32.totalorder %s248_s22, %s498_s0 }
   0x7   :  { %p254_p2 = pnand %p252_p1, %p249_p0 }
   0x9   :  { %257 = shalt.err (!%p254_p2)
}
   0xa   :  { %s258_s27 = scalar_lea.vmem %s21_s19, 256  ;;  %p263_p4 = scmp.lt.s32.totalorder %s21_s19, %s21_s19 }
   0xb   :  { %p259_p3 = scmp.ne.s32.totalorder %s21_s19, %s258_s27  ;;  %p264_p5 = scmp.lt.s32.totalorder %s258_s27, %s258_s27 }
   0xd   :  { %p265_p6 = por %p264_p5, %p263_p4 }
   0xf   :  { %p266_p7 = pnand %p265_p6, %p259_p3 }
  0x11   :  { %269 = shalt.err (!%p266_p7)
}
  0x12   :  { %s367_s28 = smov 128   ;;  %s368_s29 = smov 8  }
  0x13   :  { %26 = dma.hbm_to_vmem [thread:$0]  %s498_s0, 256, %s21_s19, [#allocation3], %s367_s28, %s367_s28, %s368_s29  }
  0x14   :  { %s369_s7 = smov [#allocation5]   ;;  %s270_s11 = scalar_lea.hbm %s499_s1, 512 }
  0x15   :  { %s32_s8 = sshll.u32 %s369_s7, 4  ;;  %p271_p8 = scmp.ne.s32.totalorder %s499_s1, %s270_s11  ;;  %s33_s8 = int_to_ptr.vmem [resolvable:$true] %s32_s8 }
  0x16   :  { %p274_p9 = scmp.lt.u32.totalorder %s270_s11, %s499_s1 }
  0x18   :  { %p276_p10 = pnand %p274_p9, %p271_p8 }
  0x1a   :  { %279 = shalt.err (!%p276_p10)
}
  0x1b   :  { %s280_s16 = scalar_lea.vmem %s33_s8, 512  ;;  %p285_p12 = scmp.lt.s32.totalorder %s33_s8, %s33_s8 }
  0x1c   :  { %p281_p11 = scmp.ne.s32.totalorder %s33_s8, %s280_s16  ;;  %p286_p13 = scmp.lt.s32.totalorder %s280_s16, %s280_s16 }
  0x1e   :  { %p287_p0 = por %p286_p13, %p285_p12 }
  0x20   :  { %p288_p1 = pnand %p287_p0, %p281_p11 }
  0x22   :  { %291 = shalt.err (!%p288_p1)
}
  0x23   :  { %38 = dma.hbm_to_vmem [thread:$0]  %s499_s1, 512, %s33_s8, [#allocation6], %s367_s28, %s367_s28, %s368_s29  }
  0x24   :  { %358 = dma.done.wait [#allocation3], 256  }
  0x25   :  { %359 = vsyncadd [#allocation3], 4294967040 }
  0x26   :  { %360 = dma.done.wait [#allocation6], 512  }
  0x27   :  { %361 = vsyncadd [#allocation6], 4294966784  ;;  %vm60_vm0 = vcmask 261120   ;;  %v49_v0 = vld [vmem:[#allocation5] sm:$0xff]  ;;  %v50_v1 = vld [vmem:[#allocation5 + $0x8] sm:$0xff]  ;;  %s370_s19 = smov [#allocation7]  }
  0x28   :  { %v51_v2 = vld [vmem:[#allocation5 + $0x10] sm:$0xff]  ;;  %v231_v3 = vpack.c.bf16 %v50_v1, %v49_v0  ;;  %v52_v4 = vld [vmem:[#allocation5 + $0x18] sm:$0xff]  ;;  %s167_s20 = sshll.u32 %s370_s19, 4  ;;  %s371_s21 = smov 64   ;;  %s168_s20 = int_to_ptr.vmem [resolvable:$true] %s167_s20 }
  0x29   :  { %v47_v5 = vld [vmem:[#allocation2] sm:$0xff]  ;;  %v235_v6 = vpack.c.bf16 %v52_v4, %v51_v2  ;;  %v48_v7 = vld [vmem:[#allocation2 + $0x8] sm:$0xff]  ;;  %s372_s22 = smov 96   ;;  %s292_s23 = scalar_lea.vmem %s168_s20, 256 }
  0x2a   :  { %228 = vmatprep.mubr.msk.f32.mxu0 %vm60_vm0, %v47_v5  ;;  %232 = vmatprep.subr.bf16.mxu0 %v231_v3  ;;  %v211_v8 = vld [vmem:[%s500_s2] ss:$0 sm:$0xff]  ;;  %p293_p2 = scmp.ne.s32.totalorder %s168_s20, %s292_s23  ;;  %p297_p3 = scmp.lt.s32.totalorder %s168_s20, %s168_s20 }
  0x2b   :  { %234 = vmatpush3.bf16.msra.mxu0 %v231_v3  ;;  %p298_p4 = scmp.lt.s32.totalorder %s292_s23, %s292_s23 }
  0x2c   :  { %236 = vmatprep.subr.bf16.mxu0 %v235_v6 }
  0x2d   :  { %p299_p5 = por %p298_p4, %p297_p3 }
  0x2f   :  { %238 = vmatpush3.bf16.msra.mxu0 %v235_v6  ;;  %p300_p6 = pnand %p299_p5, %p293_p2 }
  0x32   :  { %229 = vmatmul.mubr.msk.f32.vlgmr.msra.gmra.mrb[0].mxu0 %vm60_vm0, %v48_v7 }
 0x105   :  { %v230_v9 = vpop.f32.mrb[0].mxu0 }
 0x106   :  { %v139_v10 = vadd.f32 %v230_v9, %v211_v8  ;;  %v133_v11 = vpop.f32.mrb[1].mxu0 }
 0x107   :  { %v134_v12 = vadd.f32 %v211_v8, %v133_v11 }
 0x108   :  { %143 = vst.msk [vmem:[#allocation7 + $0x8] sm:$0xff] %vm60_vm0, %v139_v10 }
 0x109   :  { %142 = vst.msk [vmem:[#allocation7] sm:$0xff] %vm60_vm0, %v134_v12  ;;  %154 = vrot.lane.b32.xlu1 %v134_v12, %s371_s21  ;;  %146 = vrot.lane.b32.xlu0 %v134_v12, %s372_s22 }
 0x10a   :  { %303 = shalt.err (!%p300_p6)
}
 0x10b   :  { %s304_s25 = scalar_lea.hbm %s501_s3, 256 }
 0x10c   :  { %p305_p7 = scmp.ne.s32.totalorder %s501_s3, %s304_s25  ;;  %p308_p8 = scmp.lt.u32.totalorder %s304_s25, %s501_s3 }
 0x10e   :  { %p310_p9 = pnand %p308_p8, %p305_p7 }
 0x110   :  { %313 = shalt.err (!%p310_p9)
}
 0x111   :  { %173 = dma.vmem_to_hbm [thread:$0]  %s168_s20, 256, %s501_s3, [#allocation4], %s367_s28, %s367_s28, %s368_s29  }
 0x112   :  { %156 = vrot.lane.b32.xlu1 %v139_v10, %s371_s21  ;;  %148 = vrot.lane.b32.xlu0 %v139_v10, %s372_s22  ;;  %s373_s9 = smov [#allocation8]   ;;  %s374_s11 = smov [#allocation10]  }
 0x113   :  { %s179_s10 = sshll.u32 %s373_s9, 4  ;;  %s191_s12 = sshll.u32 %s374_s11, 4  ;;  %s180_s10 = int_to_ptr.vmem [resolvable:$true] %s179_s10  ;;  %s459_s12 = int_to_ptr.vmem [resolvable:$true] %s191_s12 }
 0x114   :  { %s314_s3 = scalar_lea.vmem %s180_s10, 256  ;;  %p319_p11 = scmp.lt.s32.totalorder %s180_s10, %s180_s10 }
 0x115   :  { %p315_p10 = scmp.ne.s32.totalorder %s180_s10, %s314_s3  ;;  %p320_p12 = scmp.lt.s32.totalorder %s314_s3, %s314_s3 }
 0x117   :  { %p321_p13 = por %p320_p12, %p319_p11 }
 0x119   :  { %p322_p0 = pnand %p321_p13, %p315_p10 }
 0x17b   :  { %v155_v13 = vpop.permute.xlu1 %154  ;;  %v147_v14 = vpop.permute.xlu0 %146 }
 0x17c   :  { %160 = vst.msk [vmem:[#allocation10] sm:$0xff] %vm60_vm0, %v155_v13  ;;  %152 = vst.msk [vmem:[#allocation8] sm:$0xff] %vm60_vm0, %v147_v14 }
 0x184   :  { %v157_v15 = vpop.permute.xlu1 %156  ;;  %v149_v16 = vpop.permute.xlu0 %148 }
 0x185   :  { %161 = vst.msk [vmem:[#allocation10 + $0x8] sm:$0xff] %vm60_vm0, %v157_v15  ;;  %153 = vst.msk [vmem:[#allocation8 + $0x8] sm:$0xff] %vm60_vm0, %v149_v16 }
 0x186   :  { %325 = shalt.err (!%p322_p0)
}
 0x187   :  { %s326_s15 = scalar_lea.hbm %s502_s4, 256 }
 0x188   :  { %p327_p1 = scmp.ne.s32.totalorder %s502_s4, %s326_s15  ;;  %p330_p2 = scmp.lt.u32.totalorder %s326_s15, %s502_s4 }
 0x18a   :  { %p332_p3 = pnand %p330_p2, %p327_p1 }
 0x18c   :  { %335 = shalt.err (!%p332_p3)
}
 0x18d   :  { %185 = dma.vmem_to_hbm [thread:$0]  %s180_s10, 256, %s502_s4, [#allocation9], %s367_s28, %s367_s28, %s368_s29  }
 0x18e   :  { %s336_s20 = scalar_lea.vmem %s459_s12, 256  ;;  %p341_p5 = scmp.lt.s32.totalorder %s459_s12, %s459_s12 }
 0x18f   :  { %p337_p4 = scmp.ne.s32.totalorder %s459_s12, %s336_s20  ;;  %p342_p6 = scmp.lt.s32.totalorder %s336_s20, %s336_s20 }
 0x191   :  { %p343_p7 = por %p342_p6, %p341_p5 }
 0x193   :  { %p344_p8 = pnand %p343_p7, %p337_p4 }
 0x195   :  { %347 = shalt.err (!%p344_p8)
}
 0x196   :  { %s348_s23 = scalar_lea.hbm %s503_s5, 256 }
 0x197   :  { %p349_p9 = scmp.ne.s32.totalorder %s503_s5, %s348_s23  ;;  %p352_p10 = scmp.lt.u32.totalorder %s348_s23, %s503_s5 }
 0x199   :  { %p354_p11 = pnand %p352_p10, %p349_p9 }
 0x19b   :  { %357 = shalt.err (!%p354_p11)
}
 0x19c   :  { %197 = dma.vmem_to_hbm [thread:$0]  %s459_s12, 256, %s503_s5, [#allocation9], %s367_s28, %s367_s28, %s368_s29  }
 0x19d   :  { %362 = dma.done.wait [#allocation4], 256  }
 0x19e   :  { %363 = vsyncadd [#allocation4], 4294967040 }
 0x19f   :  { %364 = dma.done.wait [#allocation9], 512  }
 0x1a0   :  { %365 = vsyncadd [#allocation9], 4294966784 }
 0x1a1   :  { %207 = vsyncpa [#allocation3], 1 }
 0x1a2   :  { %208 = vsyncpa [#allocation6], 1 }
 0x1a3   :  { %209 = vsyncpa [#allocation4], 1 }
 0x1a4   :  { %210 = vsyncpa [#allocation9], 1 }

</bundles_post_ra>
